<compile_context>
chip_gen: v7x
topology: tpu7x:2x2x1
jax: 0.10.0
libtpu: 0.0.40
codegen_flags: <defaults>
</compile_context>

<pallas_src>
import functools

import jax
import jax.numpy as jnp
from jax.experimental import pallas as pl
from jax.experimental.pallas import tpu as pltpu

IN_F, H1_F, H2_F, OUT_F = 20, 64, 32, 16


def _round_up(n, m):
    return ((n + m - 1) // m) * m


def nest_mlp_kernel(x_ref, w1_ref, b1_ref, w2_ref, b2_ref, w3_ref, b3_ref, o_ref):
    # Batch rides the lane (last) axis: x_ref is (20, TB) bf16.
    xT = x_ref[...]

    # seq_net: Linear(20, 64) -> ReLU              -> (64, TB)
    h1 = jnp.dot(w1_ref[...], xT, preferred_element_type=jnp.float32) + b1_ref[...]
    h1 = jnp.maximum(h1, 0.0).astype(jnp.bfloat16)

    # seq_net: Linear(64, 32) -> ReLU              -> (32, TB)
    h2 = jnp.dot(w2_ref[...], h1, preferred_element_type=jnp.float32) + b2_ref[...]
    h2 = jnp.maximum(h2, 0.0).astype(jnp.bfloat16)

    # linear: Linear(32, 16)                        -> (16, TB)
    y = jnp.dot(w3_ref[...], h2, preferred_element_type=jnp.float32) + b3_ref[...]
    o_ref[...] = y.astype(o_ref.dtype)


@functools.partial(jax.jit, static_argnames=("block_b",))
def nest_mlp_forward(x, params, *, block_b=512):
    """x: (B, 20) f32. Returns (B, 16) f32."""
    w1, b1, w2, b2, w3, b3 = params
    B = x.shape[0]

    # Batch tile: multiple of 128 so the lane axis is fully dense.
    TB = min(block_b, _round_up(B, 128))
    B_pad = _round_up(B, TB)
    n_tiles = B_pad // TB

    # Lane-dense layout: batch on the last (lane) axis, bf16 matmul operands.
    x_pad = jnp.pad(x, ((0, B_pad - B), (0, 0)))
    xT = x_pad.T.astype(jnp.bfloat16)                      # (20, B_pad)
    w1b, w2b, w3b = (w.astype(jnp.bfloat16) for w in (w1, w2, w3))

    flops = 2 * B_pad * (IN_F * H1_F + H1_F * H2_F + H2_F * OUT_F)
    bytes_accessed = (
        xT.size * 2
        + OUT_F * B_pad * 4
        + (w1b.size + w2b.size + w3b.size) * 2
        + (b1.size + b2.size + b3.size) * 4
    )

    const = lambda shape: pl.BlockSpec(shape, lambda i: (0, 0))

    yT = pl.pallas_call(
        nest_mlp_kernel,
        out_shape=jax.ShapeDtypeStruct((OUT_F, B_pad), jnp.float32),
        grid=(n_tiles,),
        in_specs=[
            pl.BlockSpec((IN_F, TB), lambda i: (0, i)),    # x^T tile
            const((H1_F, IN_F)), const((H1_F, 1)),         # W1, b1 (VMEM-resident)
            const((H2_F, H1_F)), const((H2_F, 1)),         # W2, b2
            const((OUT_F, H2_F)), const((OUT_F, 1)),       # W3, b3
        ],
        out_specs=pl.BlockSpec((OUT_F, TB), lambda i: (0, i)),
        compiler_params=pltpu.CompilerParams(
            dimension_semantics=("parallel",),
            vmem_limit_bytes=32 * 1024 * 1024,
        ),
        cost_estimate=pl.CostEstimate(
            flops=flops, transcendentals=0, bytes_accessed=bytes_accessed),
    )(xT, w1b, b1, w2b, b2, w3b, b3)

    return yT.T[:B]                                        # back to (B, 16)


def init_params(key):
    """PyTorch nn.Linear-style init: W is (out, in), b is (out, 1),
    both uniform in ±1/sqrt(fan_in). Stored in f32 (master copy)."""
    def linear_init(key, fan_in, fan_out):
        kw, kb = jax.random.split(key)
        bound = 1.0 / jnp.sqrt(fan_in)
        w = jax.random.uniform(kw, (fan_out, fan_in), jnp.float32, -bound, bound)
        b = jax.random.uniform(kb, (fan_out, 1), jnp.float32, -bound, bound)
        return w, b

    k1, k2, k3 = jax.random.split(key, 3)
    w1, b1 = linear_init(k1, IN_F, H1_F)
    w2, b2 = linear_init(k2, H1_F, H2_F)
    w3, b3 = linear_init(k3, H2_F, OUT_F)
    return w1, b1, w2, b2, w3, b3


def reference_forward(x, params):
    """Pure-JAX reference mirroring the kernel's bf16 quantization points."""
    w1, b1, w2, b2, w3, b3 = params
    q = lambda a: a.astype(jnp.bfloat16).astype(jnp.float32)
    hi = jax.lax.Precision.HIGHEST
    h1 = jnp.maximum(jnp.dot(q(x), q(w1).T, precision=hi) + b1.T, 0.0)
    h2 = jnp.maximum(jnp.dot(q(h1), q(w2).T, precision=hi) + b2.T, 0.0)
    return jnp.dot(q(h2), q(w3).T, precision=hi) + b3.T


if __name__ == "__main__":
    key = jax.random.PRNGKey(0)
    k_params, k_x = jax.random.split(key)

    params = init_params(k_params)
    batch = 8
    x = jax.random.normal(k_x, (batch, IN_F), jnp.float32)

    out = jax.block_until_ready(nest_mlp_forward(x, params))
    ref = reference_forward(x, params)

    assert out.shape == (batch, OUT_F), out.shape
    # bf16 matmul operands -> loosened tolerance vs the f32-math reference.
    assert jnp.allclose(out, ref, atol=2e-2, rtol=2e-2), \
        float(jnp.max(jnp.abs(out - ref)))

    print("KERNEL_OK")
</pallas_src>

<mosaic_0001>
module attributes {stable_mosaic.version = 11 : i64} {
  func.func @nest_mlp_kernel(%arg0: i32, %arg1: memref<20x128xbf16, #tpu.memory_space<vmem>>, %arg2: memref<64x20xbf16, #tpu.memory_space<vmem>>, %arg3: memref<64x1xf32, #tpu.memory_space<vmem>>, %arg4: memref<32x64xbf16, #tpu.memory_space<vmem>>, %arg5: memref<32x1xf32, #tpu.memory_space<vmem>>, %arg6: memref<16x32xbf16, #tpu.memory_space<vmem>>, %arg7: memref<16x1xf32, #tpu.memory_space<vmem>>, %arg8: memref<16x128xf32, #tpu.memory_space<vmem>>) attributes {dimension_semantics = [#tpu.dimension_semantics<parallel>], iteration_bounds = array<i64: 1>, scalar_prefetch = 0 : i64, scratch_operands = 0 : i64, tpu.core_type = #tpu.core_type<tc>, window_params = [{transform_indices = @transform_0, window_bounds = array<i64: 20, 128>}, {pipeline_mode = #tpu.pipeline_mode<synchronous>, transform_indices = @transform_1, window_bounds = array<i64: 64, 20>}, {pipeline_mode = #tpu.pipeline_mode<synchronous>, transform_indices = @transform_2, window_bounds = array<i64: 64, 1>}, {pipeline_mode = #tpu.pipeline_mode<synchronous>, transform_indices = @transform_3, window_bounds = array<i64: 32, 64>}, {pipeline_mode = #tpu.pipeline_mode<synchronous>, transform_indices = @transform_4, window_bounds = array<i64: 32, 1>}, {pipeline_mode = #tpu.pipeline_mode<synchronous>, transform_indices = @transform_5, window_bounds = array<i64: 16, 32>}, {pipeline_mode = #tpu.pipeline_mode<synchronous>, transform_indices = @transform_6, window_bounds = array<i64: 16, 1>}, {transform_indices = @transform_7, window_bounds = array<i64: 16, 128>}]} {
    %c0 = arith.constant 0 : index
    %c0_0 = arith.constant 0 : index
    %0 = vector.load %arg1[%c0, %c0_0] : memref<20x128xbf16, #tpu.memory_space<vmem>>, vector<20x128xbf16>
    %c0_1 = arith.constant 0 : index
    %c0_2 = arith.constant 0 : index
    %1 = vector.load %arg2[%c0_1, %c0_2] : memref<64x20xbf16, #tpu.memory_space<vmem>>, vector<64x20xbf16>
    %cst = arith.constant dense<0.000000e+00> : vector<64x128xf32>
    %2 = tpu.matmul %1, %0, %cst {dimension_numbers = #tpu.dot_dimension_numbers<[1], [0], [0], [1], [0, 0, 1, 1], [], []>} : vector<64x20xbf16>, vector<20x128xbf16>, vector<64x128xf32> -> vector<64x128xf32>
    %c0_3 = arith.constant 0 : index
    %c0_4 = arith.constant 0 : index
    %3 = vector.load %arg3[%c0_3, %c0_4] : memref<64x1xf32, #tpu.memory_space<vmem>>, vector<64x1xf32>
    %4 = vector.broadcast %3 : vector<64x1xf32> to vector<64x128xf32>
    %5 = arith.addf %2, %4 : vector<64x128xf32>
    %cst_5 = arith.constant 0.000000e+00 : f32
    %6 = vector.broadcast %cst_5 : f32 to vector<64x128xf32>
    %7 = arith.maximumf %5, %6 : vector<64x128xf32>
    %8 = arith.truncf %7 : vector<64x128xf32> to vector<64x128xbf16>
    %c0_6 = arith.constant 0 : index
    %c0_7 = arith.constant 0 : index
    %9 = vector.load %arg4[%c0_6, %c0_7] : memref<32x64xbf16, #tpu.memory_space<vmem>>, vector<32x64xbf16>
    %cst_8 = arith.constant dense<0.000000e+00> : vector<32x128xf32>
    %10 = tpu.matmul %9, %8, %cst_8 {dimension_numbers = #tpu.dot_dimension_numbers<[1], [0], [0], [1], [0, 0, 1, 1], [], []>} : vector<32x64xbf16>, vector<64x128xbf16>, vector<32x128xf32> -> vector<32x128xf32>
    %c0_9 = arith.constant 0 : index
    %c0_10 = arith.constant 0 : index
    %11 = vector.load %arg5[%c0_9, %c0_10] : memref<32x1xf32, #tpu.memory_space<vmem>>, vector<32x1xf32>
    %12 = vector.broadcast %11 : vector<32x1xf32> to vector<32x128xf32>
    %13 = arith.addf %10, %12 : vector<32x128xf32>
    %cst_11 = arith.constant 0.000000e+00 : f32
    %14 = vector.broadcast %cst_11 : f32 to vector<32x128xf32>
    %15 = arith.maximumf %13, %14 : vector<32x128xf32>
    %16 = arith.truncf %15 : vector<32x128xf32> to vector<32x128xbf16>
    %c0_12 = arith.constant 0 : index
    %c0_13 = arith.constant 0 : index
    %17 = vector.load %arg6[%c0_12, %c0_13] : memref<16x32xbf16, #tpu.memory_space<vmem>>, vector<16x32xbf16>
    %cst_14 = arith.constant dense<0.000000e+00> : vector<16x128xf32>
    %18 = tpu.matmul %17, %16, %cst_14 {dimension_numbers = #tpu.dot_dimension_numbers<[1], [0], [0], [1], [0, 0, 1, 1], [], []>} : vector<16x32xbf16>, vector<32x128xbf16>, vector<16x128xf32> -> vector<16x128xf32>
    %c0_15 = arith.constant 0 : index
    %c0_16 = arith.constant 0 : index
    %19 = vector.load %arg7[%c0_15, %c0_16] : memref<16x1xf32, #tpu.memory_space<vmem>>, vector<16x1xf32>
    %20 = vector.broadcast %19 : vector<16x1xf32> to vector<16x128xf32>
    %21 = arith.addf %18, %20 : vector<16x128xf32>
    %c0_17 = arith.constant 0 : index
    %c0_18 = arith.constant 0 : index
    %22 = vector.load %arg8[%c0_17, %c0_18] : memref<16x128xf32, #tpu.memory_space<vmem>>, vector<16x128xf32>
    tpu.vector_store %arg8[%c0_17, %c0_18], %21 {strides = array<i32>} : memref<16x128xf32, #tpu.memory_space<vmem>>, vector<16x128xf32>,
    return
  }
  func.func @transform_0(%arg0: i32) -> (i32, i32) {
    %c0_i32 = arith.constant 0 : i32
    %c0_i32_0 = arith.constant 0 : i32
    return %c0_i32, %arg0 : i32, i32
  }
  func.func @transform_1(%arg0: i32) -> (i32, i32) {
    %c0_i32 = arith.constant 0 : i32
    %c0_i32_0 = arith.constant 0 : i32
    %c0_i32_1 = arith.constant 0 : i32
    return %c0_i32, %c0_i32_0 : i32, i32
  }
  func.func @transform_2(%arg0: i32) -> (i32, i32) {
    %c0_i32 = arith.constant 0 : i32
    %c0_i32_0 = arith.constant 0 : i32
    %c0_i32_1 = arith.constant 0 : i32
    return %c0_i32, %c0_i32_0 : i32, i32
  }
  func.func @transform_3(%arg0: i32) -> (i32, i32) {
    %c0_i32 = arith.constant 0 : i32
    %c0_i32_0 = arith.constant 0 : i32
    %c0_i32_1 = arith.constant 0 : i32
    return %c0_i32, %c0_i32_0 : i32, i32
  }
  func.func @transform_4(%arg0: i32) -> (i32, i32) {
    %c0_i32 = arith.constant 0 : i32
    %c0_i32_0 = arith.constant 0 : i32
    %c0_i32_1 = arith.constant 0 : i32
    return %c0_i32, %c0_i32_0 : i32, i32
  }
  func.func @transform_5(%arg0: i32) -> (i32, i32) {
    %c0_i32 = arith.constant 0 : i32
    %c0_i32_0 = arith.constant 0 : i32
    %c0_i32_1 = arith.constant 0 : i32
    return %c0_i32, %c0_i32_0 : i32, i32
  }
  func.func @transform_6(%arg0: i32) -> (i32, i32) {
    %c0_i32 = arith.constant 0 : i32
    %c0_i32_0 = arith.constant 0 : i32
    %c0_i32_1 = arith.constant 0 : i32
    return %c0_i32, %c0_i32_0 : i32, i32
  }
  func.func @transform_7(%arg0: i32) -> (i32, i32) {
    %c0_i32 = arith.constant 0 : i32
    %c0_i32_0 = arith.constant 0 : i32
    return %c0_i32, %arg0 : i32, i32
  }
}

</mosaic_0001>

<bundles_post_ra>
// kernel: nest_mlp_forward.1
= control target key start
LH: loop header
LB: loop body
LE: loop exit
PB: predicated region body
PF: predicated region fallthrough
CT: control target
= control target key end

     0   :  { %vm115_vm0 = vcmask 162816   ;;  %v457_v0 = vmov 0   ;;  %vm128_vm1 = vcmask 1041408   ;;  %vm247_vm2 = vcmask 523264   ;;  %s581_s0 = inlined_call_operand.vmem [shape: bf16[20,128], index: 0, kind: input, shape index: {}]   ;;  %s582_s1 = inlined_call_operand.vmem [shape: bf16[64,20], index: 1, kind: input, shape index: {}]   ;;  %s583_s2 = inlined_call_operand.vmem [shape: f32[64,1], index: 2, kind: input, shape index: {}]   ;;  %s584_s4 = inlined_call_operand.vmem [shape: f32[32,1], index: 4, kind: input, shape index: {}]   ;;  %s585_s6 = inlined_call_operand.vmem [shape: f32[16,1], index: 6, kind: input, shape index: {}]   ;;  %s586_s3 = inlined_call_operand.vmem [shape: bf16[32,64], index: 3, kind: input, shape index: {}]   ;;  %s587_s5 = inlined_call_operand.vmem [shape: bf16[16,32], index: 5, kind: input, shape index: {}]   ;;  %s588_s7 = inlined_call_operand.vmem [shape: f32[16,128], index: 7, kind: output, shape index: {}]  }
   0x1   :  { %446 = vset.pattern.permute.xlu0 %v457_v0  ;;  %447 = vset.pattern.permute.xlu1 %v457_v0  ;;  %v448_v1 = vld [vmem:[%s581_s0] sm:$0xff]   ;;  %v449_v2 = vld [vmem:[%s581_s0 + $0x8] ss:$0 sps:$4 sm:$0x33]   ;;  %v40_v6 = vld [vmem:[%s583_s2 + $0x10] sm:$0xff]  ;;  %v458_v60 = vmov 0.0  }
   0x2   :  { %v450_v3 = vld [vmem:[%s582_s1] sm:$0xff]   ;;  %410 = vmatprep.subr.bf16.mxu0 %v448_v1  ;;  %v130_v4 = vsel %vm128_vm1, %v449_v2, 0  ;;  %v451_v7 = vld [vmem:[%s582_s1 + $0x8] sm:$0xff]   ;;  %58 = vperm.xlu1 %447, %v40_v6   ;;  %v452_v9 = vld [vmem:[%s582_s1 + $0x10] sm:$0xff]   ;;  %vm459_vm3 = vmmov 0   ;;  %vm328_vm4 = vcmask 261120  }
   0x3   :  { %411 = vmatpush3.bf16.msra.mxu0 %v448_v1  ;;  %414 = vmatprep.mubr.msk.bf16.mxu0 %vm115_vm0, %v450_v3  ;;  %v38_v5 = vld [vmem:[%s583_s2] sm:$0xff]  ;;  %v39_v8 = vld [vmem:[%s583_s2 + $0x8] sm:$0xff]  ;;  %v41_v10 = vld [vmem:[%s583_s2 + $0x18] sm:$0xff] }
   0x4   :  { %442 = vmatprep.subr.msk.bf16.mxu0 %vm128_vm1, %v449_v2  ;;  %48 = vperm.xlu0 %446, %v38_v5   ;;  %v42_v11 = vld [vmem:[%s583_s2 + $0x20] sm:$0xff]  ;;  %v43_v12 = vld [vmem:[%s583_s2 + $0x28] sm:$0xff]  ;;  %v453_v13 = vld [vmem:[%s582_s1 + $0x18] sm:$0xff]  }
   0x5   :  { %v44_v14 = vld [vmem:[%s583_s2 + $0x30] sm:$0xff]  ;;  %v45_v15 = vld [vmem:[%s583_s2 + $0x38] sm:$0xff]  ;;  %v213_v16 = vld [vmem:[%s584_s4] sm:$0xff] }
   0x6   :  { %63 = vperm.xlu1 %447, %v41_v10   ;;  %v214_v17 = vld [vmem:[%s584_s4 + $0x8] sm:$0xff]  ;;  %v215_v18 = vld [vmem:[%s584_s4 + $0x10] sm:$0xff]  ;;  %v216_v19 = vld [vmem:[%s584_s4 + $0x18] sm:$0xff] }
   0x7   :  { %413 = vmatpush3.bf16.msra.mxu0 %v130_v4  ;;  %v311_v20 = vld [vmem:[%s585_s6] sm:$0xff]  ;;  %v312_v21 = vld [vmem:[%s585_s6 + $0x8] sm:$0xff] }
   0x8   :  { %53 = vperm.xlu0 %446, %v39_v8   ;;  %v454_v22 = vld [vmem:[%s586_s3] sm:$0xff]   ;;  %v455_v59 = vld [vmem:[%s586_s3 + $0x8] sm:$0xff]   ;;  %434 = vmatprep.subr.bf16.mxu0 %v458_v60 }
   0x9   :  { %430 = vmatprep.mubr.msk.bf16.mxu1 %vm247_vm2, %v454_v22 }
   0xa   :  { %415 = vmatmul.mubr.msk.bf16.vlgmr.msra.gmra.mrb[0].mxu0 %vm115_vm0, %v451_v7  ;;  %73 = vperm.xlu1 %447, %v43_v12  }
   0xb   :  { %418 = vmatprep.mubr.msk.bf16.mxu0 %vm115_vm0, %v452_v9 }
   0xc   :  { %68 = vperm.xlu0 %446, %v42_v11  }
   0xe   :  { %83 = vperm.xlu1 %447, %v45_v15   ;;  %v456_v15 = vld [vmem:[%s587_s5] sm:$0xff]  }
  0x10   :  { %78 = vperm.xlu0 %446, %v44_v14  }
  0x12   :  { %419 = vmatmul.mubr.msk.bf16.gmra.mrb[4].mxu0 %vm115_vm0, %v453_v13  ;;  %224 = vperm.xlu1 %447, %v214_v17  }
  0x13   :  { %438 = vmatprep.mubr.msk.bf16.mxu0 %vm459_vm3, %v458_v60 }
  0x14   :  { %219 = vperm.xlu0 %446, %v213_v16  }
  0x16   :  { %234 = vperm.xlu1 %447, %v216_v19  }
  0x18   :  { %229 = vperm.xlu0 %446, %v215_v18  }
  0x1a   :  { %320 = vperm.xlu1 %447, %v312_v21  }
  0x1c   :  { %315 = vperm.xlu0 %446, %v311_v20  }
  0x81   :  { %v59_v24 = vpop.permute.xlu1 %58 }
  0x83   :  { %v49_v23 = vpop.permute.xlu0 %48 }
  0x85   :  { %v64_v26 = vpop.permute.xlu1 %63 }
  0x87   :  { %v54_v25 = vpop.permute.xlu0 %53 }
  0x89   :  { %v74_v35 = vpop.permute.xlu1 %73 }
  0x8b   :  { %v69_v30 = vpop.permute.xlu0 %68 }
  0x8d   :  { %v84_v47 = vpop.permute.xlu1 %83 }
  0x8f   :  { %v79_v42 = vpop.permute.xlu0 %78 }
  0x91   :  { %v225_v62 = vpop.permute.xlu1 %224 }
  0x93   :  { %v220_v61 = vpop.permute.xlu0 %219 }
  0x95   :  { %v235_v3 = vpop.permute.xlu1 %234 }
  0x97   :  { %v230_v63 = vpop.permute.xlu0 %229 }
  0x99   :  { %v321_v20 = vpop.permute.xlu1 %320 }
  0x9b   :  { %v316_v16 = vpop.permute.xlu0 %315 }
  0xdd   :  { %v416_v27 = vpop.f32.mrb[0].mxu0 }
  0xde   :  { %v175_v28 = vadd.f32 %v416_v27, %v59_v24  ;;  %v166_v29 = vpop.f32.mrb[1].mxu0 }
  0xdf   :  { %v167_v31 = vadd.f32 %v166_v29, %v49_v23  ;;  %v417_v32 = vpop.f32.mrb[2].mxu0 }
  0xe0   :  { %v178_v33 = vadd.f32 %v417_v32, %v64_v26  ;;  %v169_v34 = vpop.f32.mrb[3].mxu0  ;;  %v199_v37 = vmax.f32 %v175_v28, 0.0 }
  0xe1   :  { %v170_v36 = vadd.f32 %v169_v34, %v54_v25  ;;  %v197_v39 = vmax.f32 %v167_v31, 0.0 }
  0xe2   :  { %v200_v38 = vmax.f32 %v178_v33, 0.0 }
  0xe3   :  { %v198_v40 = vmax.f32 %v170_v36, 0.0 }
  0xe4   :  { %v206_v41 = vpack.c.bf16 %v200_v38, %v199_v37 }
  0xe5   :  { %v420_v43 = vpop.f32.mrb[4].mxu0  ;;  %v205_v44 = vpack.c.bf16 %v198_v40, %v197_v39 }
  0xe6   :  { %v191_v45 = vadd.f32 %v420_v43, %v79_v42  ;;  %v182_v46 = vpop.f32.mrb[5].mxu0 }
  0xe7   :  { %v183_v48 = vadd.f32 %v182_v46, %v69_v30  ;;  %v421_v49 = vpop.f32.mrb[6].mxu0  ;;  %422 = vmatprep.subr.bf16.mxu1 %v205_v44 }
  0xe8   :  { %v194_v50 = vadd.f32 %v421_v49, %v84_v47  ;;  %v185_v51 = vpop.f32.mrb[7].mxu0  ;;  %423 = vmatpush3.bf16.msra.mxu1 %v205_v44  ;;  %v203_v53 = vmax.f32 %v191_v45, 0.0 }
  0xe9   :  { %v186_v52 = vadd.f32 %v185_v51, %v74_v35  ;;  %424 = vmatprep.subr.bf16.mxu1 %v206_v41  ;;  %v201_v55 = vmax.f32 %v183_v48, 0.0 }
  0xea   :  { %v204_v54 = vmax.f32 %v194_v50, 0.0 }
  0xeb   :  { %v202_v56 = vmax.f32 %v186_v52, 0.0 }
  0xec   :  { %v208_v57 = vpack.c.bf16 %v204_v54, %v203_v53  ;;  %425 = vmatpush3.bf16.msra.mxu1 %v206_v41 }
  0xed   :  { %v207_v58 = vpack.c.bf16 %v202_v56, %v201_v55 }
  0xef   :  { %426 = vmatprep.subr.bf16.mxu1 %v207_v58 }
  0xf0   :  { %427 = vmatpush3.bf16.msra.mxu1 %v207_v58 }
  0xf1   :  { %428 = vmatprep.subr.bf16.mxu1 %v208_v57 }
  0xf4   :  { %429 = vmatpush3.bf16.msra.mxu1 %v208_v57 }
  0xf7   :  { %431 = vmatmul.mubr.msk.bf16.vlgmr.msra.gmra.mrb[0].mxu1 %vm247_vm2, %v455_v59 }
 0x1ca   :  { %v432_v0 = vpop.f32.mrb[0].mxu1 }
 0x1cb   :  { %v297_v1 = vadd.f32 %v432_v0, %v230_v63  ;;  %v288_v2 = vpop.f32.mrb[1].mxu1 }
 0x1cc   :  { %v289_v4 = vadd.f32 %v288_v2, %v220_v61  ;;  %v433_v5 = vpop.f32.mrb[2].mxu1 }
 0x1cd   :  { %v300_v6 = vadd.f32 %v433_v5, %v235_v3  ;;  %v291_v7 = vpop.f32.mrb[3].mxu1  ;;  %v305_v9 = vmax.f32 %v297_v1, 0.0 }
 0x1ce   :  { %v292_v8 = vadd.f32 %v291_v7, %v225_v62  ;;  %v303_v11 = vmax.f32 %v289_v4, 0.0 }
 0x1cf   :  { %v306_v10 = vmax.f32 %v300_v6, 0.0 }
 0x1d0   :  { %v304_v12 = vmax.f32 %v292_v8, 0.0 }
 0x1d1   :  { %v308_v13 = vpack.c.bf16 %v306_v10, %v305_v9 }
 0x1d2   :  { %v307_v14 = vpack.c.bf16 %v304_v12, %v303_v11 }
 0x1d4   :  { %435 = vmatpush3.bf16.msra.mxu0 %v307_v14 }
 0x1d5   :  { %436 = vmatprep.subr.bf16.mxu0 %v458_v60 }
 0x1d8   :  { %437 = vmatpush3.bf16.msra.mxu0 %v308_v13 }
 0x1db   :  { %439 = vmatmul.mubr.msk.bf16.vlgmr.msra.gmra.mrb[8].mxu0 %vm328_vm4, %v456_v15 }
 0x2ae   :  { %v366_v17 = vpop.f32.mrb[8].mxu0 }
 0x2af   :  { %v367_v18 = vadd.f32 %v366_v17, %v316_v16  ;;  %v440_v19 = vpop.f32.mrb[9].mxu0 }
 0x2b0   :  { %v369_v21 = vpop.f32.mrb[10].mxu0 }
 0x2b1   :  { %373 = vst [vmem:[%s588_s7] sm:$0xff] %v367_v18  ;;  %v370_v22 = vadd.f32 %v369_v21, %v321_v20  ;;  %v441_v23 = vpop.f32.mrb[11].mxu0 }
 0x2b3   :  { %374 = vst [vmem:[%s588_s7 + $0x8] sm:$0xff] %v370_v22 }

</bundles_post_ra>
